<compile_context>
chip_gen: v5e
topology: v5e:2x2
jax: 0.10.0
libtpu: 0.0.40
codegen_flags: <defaults>
</compile_context>

<pallas_src>
import jax
import jax.numpy as jnp
from jax.experimental import pallas as pl
from jax.experimental.pallas import tpu as pltpu


def _rx_kernel(x_ref,
               w1_ref, b1_ref,
               w2_ref, b2_ref,
               w3_ref, b3_ref,
               w4_ref, b4_ref,
               o_ref):
    # One TM-row tile of the batch; all weights resident in VMEM.
    h = jnp.dot(x_ref[...], w1_ref[...], preferred_element_type=jnp.float32)
    h = jnp.maximum(h + b1_ref[...], 0.0)

    h = jnp.dot(h, w2_ref[...], preferred_element_type=jnp.float32)
    h = jnp.maximum(h + b2_ref[...], 0.0)

    h = jnp.dot(h, w3_ref[...], preferred_element_type=jnp.float32)
    h = jnp.maximum(h + b3_ref[...], 0.0)

    out = jnp.dot(h, w4_ref[...], preferred_element_type=jnp.float32)
    o_ref[...] = (out + b4_ref[...]).astype(o_ref.dtype)


def _round_up(a, m):
    return -(-a // m) * m


def _pad2d(a, rows, cols):
    return jnp.pad(a, ((0, rows - a.shape[0]), (0, cols - a.shape[1])))


def rx_forward(x, params, *, tm=1024):
    """x: (N, Do) float32. params: dict of (in,out) weights and (1,out) biases.

    tm: target batch tile (rows). Clamped/rounded so the block shape always
    satisfies the (8, 128) tiling constraint; the batch is zero-padded up to a
    multiple of the effective tile.
    """
    n, do = x.shape
    hidden = params["w1"].shape[1]
    nbins = params["w4"].shape[1]

    # Lane-dense padded widths (multiples of 128).
    hid_p = _round_up(hidden, 128)
    nb_p = _round_up(nbins, 128)

    # Effective row tile: multiple of 8, no larger than the (8-rounded) batch.
    n8 = _round_up(n, 8)
    tm_eff = max(8, min(_round_up(tm, 8), n8))
    n_pad = _round_up(n8, tm_eff)
    grid = (n_pad // tm_eff,)

    # Zero-padding is exact: padded hidden/output columns get zero weight and
    # zero bias, relu(0) = 0, and zero rows of the next weight kill them again.
    x_p = jnp.pad(x, ((0, n_pad - n), (0, 0)))
    w1 = _pad2d(params["w1"], do, hid_p)
    b1 = _pad2d(params["b1"], 1, hid_p)
    w2 = _pad2d(params["w2"], hid_p, hid_p)
    b2 = _pad2d(params["b2"], 1, hid_p)
    w3 = _pad2d(params["w3"], hid_p, hid_p)
    b3 = _pad2d(params["b3"], 1, hid_p)
    w4 = _pad2d(params["w4"], hid_p, nb_p)
    b4 = _pad2d(params["b4"], 1, nb_p)

    # Weights/biases: full-array blocks with constant index maps -> resident.
    def const(shape):
        return pl.BlockSpec(shape, lambda i: (0, 0))

    flops = 2 * n_pad * (do * hid_p + 2 * hid_p * hid_p + hid_p * nb_p)
    bytes_accessed = 4 * (
        n_pad * (do + nb_p)                                   # streamed x + y
        + do * hid_p + 2 * hid_p * hid_p + hid_p * nb_p       # weights
        + 3 * hid_p + nb_p)                                   # biases

    out = pl.pallas_call(
        _rx_kernel,
        out_shape=jax.ShapeDtypeStruct((n_pad, nb_p), jnp.float32),
        grid=grid,
        in_specs=[
            pl.BlockSpec((tm_eff, do), lambda i: (i, 0)),     # x: row tiles
            const((do, hid_p)), const((1, hid_p)),            # dense1
            const((hid_p, hid_p)), const((1, hid_p)),         # dense2
            const((hid_p, hid_p)), const((1, hid_p)),         # dense3
            const((hid_p, nb_p)), const((1, nb_p)),           # dense4
        ],
        out_specs=pl.BlockSpec((tm_eff, nb_p), lambda i: (i, 0)),
        compiler_params=pltpu.CompilerParams(
            dimension_semantics=("parallel",)),
        cost_estimate=pl.CostEstimate(
            flops=flops, transcendentals=0, bytes_accessed=bytes_accessed),
    )(x_p, w1, b1, w2, b2, w3, b3, w4, b4)

    return out[:n, :nbins]


def init_params(key, Do=6, hidden=64, nbins=40):
    """Deterministic PyTorch-style (Kaiming-uniform-ish) init; weights stored (in, out)."""
    dims = [(Do, hidden), (hidden, hidden), (hidden, hidden), (hidden, nbins)]
    params = {}
    for i, (fan_in, fan_out) in enumerate(dims, start=1):
        key, kw, kb = jax.random.split(key, 3)
        bound = 1.0 / jnp.sqrt(jnp.float32(fan_in))
        params[f"w{i}"] = jax.random.uniform(
            kw, (fan_in, fan_out), jnp.float32, minval=-bound, maxval=bound)
        params[f"b{i}"] = jax.random.uniform(
            kb, (1, fan_out), jnp.float32, minval=-bound, maxval=bound)
    return params


def rx_reference(x, params):
    h = jax.nn.relu(x @ params["w1"] + params["b1"])
    h = jax.nn.relu(h @ params["w2"] + params["b2"])
    h = jax.nn.relu(h @ params["w3"] + params["b3"])
    return h @ params["w4"] + params["b4"]


if __name__ == "__main__":
    Do, hidden, nbins = 6, 64, 40

    key = jax.random.PRNGKey(0)
    key, kx1, kx2 = jax.random.split(key, 3)
    params = init_params(key, Do=Do, hidden=hidden, nbins=nbins)

    # Small batch (single grid step, tile clamped to 8 rows).
    x_small = jax.random.normal(kx1, (8, Do), dtype=jnp.float32)
    out_small = jax.block_until_ready(rx_forward(x_small, params))
    ref_small = rx_reference(x_small, params)
    assert out_small.shape == (8, nbins)
    assert jnp.allclose(out_small, ref_small, atol=1e-5, rtol=1e-5), \
        "small-batch mismatch vs reference"

    # Non-multiple batch with a multi-step grid (exercises tiling + padding).
    x_big = jax.random.normal(kx2, (300, Do), dtype=jnp.float32)
    out_big = jax.block_until_ready(rx_forward(x_big, params, tm=64))
    ref_big = rx_reference(x_big, params)
    assert out_big.shape == (300, nbins)
    assert jnp.allclose(out_big, ref_big, atol=1e-5, rtol=1e-5), \
        "multi-tile mismatch vs reference"

    print("KERNEL_OK")
</pallas_src>

<mosaic_0001>
module attributes {stable_mosaic.version = 11 : i64} {
  func.func @_rx_kernel(%arg0: i32, %arg1: memref<8x6xf32, #tpu.memory_space<vmem>>, %arg2: memref<6x128xf32, #tpu.memory_space<vmem>>, %arg3: memref<1x128xf32, #tpu.memory_space<vmem>>, %arg4: memref<128x128xf32, #tpu.memory_space<vmem>>, %arg5: memref<1x128xf32, #tpu.memory_space<vmem>>, %arg6: memref<128x128xf32, #tpu.memory_space<vmem>>, %arg7: memref<1x128xf32, #tpu.memory_space<vmem>>, %arg8: memref<128x128xf32, #tpu.memory_space<vmem>>, %arg9: memref<1x128xf32, #tpu.memory_space<vmem>>, %arg10: memref<8x128xf32, #tpu.memory_space<vmem>>) attributes {dimension_semantics = [#tpu.dimension_semantics<parallel>], iteration_bounds = array<i64: 1>, scalar_prefetch = 0 : i64, scratch_operands = 0 : i64, tpu.core_type = #tpu.core_type<tc>, window_params = [{transform_indices = @transform_0, window_bounds = array<i64: 8, 6>}, {pipeline_mode = #tpu.pipeline_mode<synchronous>, transform_indices = @transform_1, window_bounds = array<i64: 6, 128>}, {pipeline_mode = #tpu.pipeline_mode<synchronous>, transform_indices = @transform_2, window_bounds = array<i64: 1, 128>}, {pipeline_mode = #tpu.pipeline_mode<synchronous>, transform_indices = @transform_3, window_bounds = array<i64: 128, 128>}, {pipeline_mode = #tpu.pipeline_mode<synchronous>, transform_indices = @transform_4, window_bounds = array<i64: 1, 128>}, {pipeline_mode = #tpu.pipeline_mode<synchronous>, transform_indices = @transform_5, window_bounds = array<i64: 128, 128>}, {pipeline_mode = #tpu.pipeline_mode<synchronous>, transform_indices = @transform_6, window_bounds = array<i64: 1, 128>}, {pipeline_mode = #tpu.pipeline_mode<synchronous>, transform_indices = @transform_7, window_bounds = array<i64: 128, 128>}, {pipeline_mode = #tpu.pipeline_mode<synchronous>, transform_indices = @transform_8, window_bounds = array<i64: 1, 128>}, {transform_indices = @transform_9, window_bounds = array<i64: 8, 128>}]} {
    %c0 = arith.constant 0 : index
    %c0_0 = arith.constant 0 : index
    %0 = vector.load %arg1[%c0, %c0_0] : memref<8x6xf32, #tpu.memory_space<vmem>>, vector<8x6xf32>
    %c0_1 = arith.constant 0 : index
    %c0_2 = arith.constant 0 : index
    %1 = vector.load %arg2[%c0_1, %c0_2] : memref<6x128xf32, #tpu.memory_space<vmem>>, vector<6x128xf32>
    %cst = arith.constant dense<0.000000e+00> : vector<8x128xf32>
    %2 = tpu.matmul %0, %1, %cst {dimension_numbers = #tpu.dot_dimension_numbers<[1], [0], [0], [1], [0, 0, 1, 1], [], []>} : vector<8x6xf32>, vector<6x128xf32>, vector<8x128xf32> -> vector<8x128xf32>
    %c0_3 = arith.constant 0 : index
    %c0_4 = arith.constant 0 : index
    %3 = vector.load %arg3[%c0_3, %c0_4] : memref<1x128xf32, #tpu.memory_space<vmem>>, vector<1x128xf32>
    %4 = vector.broadcast %3 : vector<1x128xf32> to vector<8x128xf32>
    %5 = arith.addf %2, %4 : vector<8x128xf32>
    %cst_5 = arith.constant 0.000000e+00 : f32
    %6 = vector.broadcast %cst_5 : f32 to vector<8x128xf32>
    %7 = arith.maximumf %5, %6 : vector<8x128xf32>
    %c0_6 = arith.constant 0 : index
    %c0_7 = arith.constant 0 : index
    %8 = vector.load %arg4[%c0_6, %c0_7] : memref<128x128xf32, #tpu.memory_space<vmem>>, vector<128x128xf32>
    %cst_8 = arith.constant dense<0.000000e+00> : vector<8x128xf32>
    %9 = tpu.matmul %7, %8, %cst_8 {dimension_numbers = #tpu.dot_dimension_numbers<[1], [0], [0], [1], [0, 0, 1, 1], [], []>} : vector<8x128xf32>, vector<128x128xf32>, vector<8x128xf32> -> vector<8x128xf32>
    %c0_9 = arith.constant 0 : index
    %c0_10 = arith.constant 0 : index
    %10 = vector.load %arg5[%c0_9, %c0_10] : memref<1x128xf32, #tpu.memory_space<vmem>>, vector<1x128xf32>
    %11 = vector.broadcast %10 : vector<1x128xf32> to vector<8x128xf32>
    %12 = arith.addf %9, %11 : vector<8x128xf32>
    %cst_11 = arith.constant 0.000000e+00 : f32
    %13 = vector.broadcast %cst_11 : f32 to vector<8x128xf32>
    %14 = arith.maximumf %12, %13 : vector<8x128xf32>
    %c0_12 = arith.constant 0 : index
    %c0_13 = arith.constant 0 : index
    %15 = vector.load %arg6[%c0_12, %c0_13] : memref<128x128xf32, #tpu.memory_space<vmem>>, vector<128x128xf32>
    %cst_14 = arith.constant dense<0.000000e+00> : vector<8x128xf32>
    %16 = tpu.matmul %14, %15, %cst_14 {dimension_numbers = #tpu.dot_dimension_numbers<[1], [0], [0], [1], [0, 0, 1, 1], [], []>} : vector<8x128xf32>, vector<128x128xf32>, vector<8x128xf32> -> vector<8x128xf32>
    %c0_15 = arith.constant 0 : index
    %c0_16 = arith.constant 0 : index
    %17 = vector.load %arg7[%c0_15, %c0_16] : memref<1x128xf32, #tpu.memory_space<vmem>>, vector<1x128xf32>
    %18 = vector.broadcast %17 : vector<1x128xf32> to vector<8x128xf32>
    %19 = arith.addf %16, %18 : vector<8x128xf32>
    %cst_17 = arith.constant 0.000000e+00 : f32
    %20 = vector.broadcast %cst_17 : f32 to vector<8x128xf32>
    %21 = arith.maximumf %19, %20 : vector<8x128xf32>
    %c0_18 = arith.constant 0 : index
    %c0_19 = arith.constant 0 : index
    %22 = vector.load %arg8[%c0_18, %c0_19] : memref<128x128xf32, #tpu.memory_space<vmem>>, vector<128x128xf32>
    %cst_20 = arith.constant dense<0.000000e+00> : vector<8x128xf32>
    %23 = tpu.matmul %21, %22, %cst_20 {dimension_numbers = #tpu.dot_dimension_numbers<[1], [0], [0], [1], [0, 0, 1, 1], [], []>} : vector<8x128xf32>, vector<128x128xf32>, vector<8x128xf32> -> vector<8x128xf32>
    %c0_21 = arith.constant 0 : index
    %c0_22 = arith.constant 0 : index
    %24 = vector.load %arg9[%c0_21, %c0_22] : memref<1x128xf32, #tpu.memory_space<vmem>>, vector<1x128xf32>
    %25 = vector.broadcast %24 : vector<1x128xf32> to vector<8x128xf32>
    %26 = arith.addf %23, %25 : vector<8x128xf32>
    %c0_23 = arith.constant 0 : index
    %c0_24 = arith.constant 0 : index
    %27 = vector.load %arg10[%c0_23, %c0_24] : memref<8x128xf32, #tpu.memory_space<vmem>>, vector<8x128xf32>
    tpu.vector_store %arg10[%c0_23, %c0_24], %26 {strides = array<i32>} : memref<8x128xf32, #tpu.memory_space<vmem>>, vector<8x128xf32>,
    return
  }
  func.func @transform_0(%arg0: i32) -> (i32, i32) {
    %c0_i32 = arith.constant 0 : i32
    %c0_i32_0 = arith.constant 0 : i32
    return %arg0, %c0_i32 : i32, i32
  }
  func.func @transform_1(%arg0: i32) -> (i32, i32) {
    %c0_i32 = arith.constant 0 : i32
    %c0_i32_0 = arith.constant 0 : i32
    %c0_i32_1 = arith.constant 0 : i32
    return %c0_i32, %c0_i32_0 : i32, i32
  }
  func.func @transform_2(%arg0: i32) -> (i32, i32) {
    %c0_i32 = arith.constant 0 : i32
    %c0_i32_0 = arith.constant 0 : i32
    %c0_i32_1 = arith.constant 0 : i32
    return %c0_i32, %c0_i32_0 : i32, i32
  }
  func.func @transform_3(%arg0: i32) -> (i32, i32) {
    %c0_i32 = arith.constant 0 : i32
    %c0_i32_0 = arith.constant 0 : i32
    %c0_i32_1 = arith.constant 0 : i32
    return %c0_i32, %c0_i32_0 : i32, i32
  }
  func.func @transform_4(%arg0: i32) -> (i32, i32) {
    %c0_i32 = arith.constant 0 : i32
    %c0_i32_0 = arith.constant 0 : i32
    %c0_i32_1 = arith.constant 0 : i32
    return %c0_i32, %c0_i32_0 : i32, i32
  }
  func.func @transform_5(%arg0: i32) -> (i32, i32) {
    %c0_i32 = arith.constant 0 : i32
    %c0_i32_0 = arith.constant 0 : i32
    %c0_i32_1 = arith.constant 0 : i32
    return %c0_i32, %c0_i32_0 : i32, i32
  }
  func.func @transform_6(%arg0: i32) -> (i32, i32) {
    %c0_i32 = arith.constant 0 : i32
    %c0_i32_0 = arith.constant 0 : i32
    %c0_i32_1 = arith.constant 0 : i32
    return %c0_i32, %c0_i32_0 : i32, i32
  }
  func.func @transform_7(%arg0: i32) -> (i32, i32) {
    %c0_i32 = arith.constant 0 : i32
    %c0_i32_0 = arith.constant 0 : i32
    %c0_i32_1 = arith.constant 0 : i32
    return %c0_i32, %c0_i32_0 : i32, i32
  }
  func.func @transform_8(%arg0: i32) -> (i32, i32) {
    %c0_i32 = arith.constant 0 : i32
    %c0_i32_0 = arith.constant 0 : i32
    %c0_i32_1 = arith.constant 0 : i32
    return %c0_i32, %c0_i32_0 : i32, i32
  }
  func.func @transform_9(%arg0: i32) -> (i32, i32) {
    %c0_i32 = arith.constant 0 : i32
    %c0_i32_0 = arith.constant 0 : i32
    return %arg0, %c0_i32 : i32, i32
  }
}

</mosaic_0001>

<bundles_post_ra>
// kernel: tpu_custom_call.1
= control target key start
LH: loop header
LB: loop body
LE: loop exit
PB: predicated region body
PF: predicated region fallthrough
CT: control target
= control target key end

     0   :  { %14 = vsyncpa [#allocation3], 0  ;;  %s538_s0 = inlined_call_operand.hbm [shape: f32[8,6], index: 0, kind: input, shape index: {}]   ;;  %s539_s1 = inlined_call_operand.hbm [shape: f32[6,128], index: 1, kind: input, shape index: {}]   ;;  %s540_s2 = inlined_call_operand.vmem [shape: f32[1,128], index: 2, kind: input, shape index: {}]   ;;  %s541_s3 = inlined_call_operand.hbm [shape: f32[128,128], index: 3, kind: input, shape index: {}]   ;;  %s542_s4 = inlined_call_operand.vmem [shape: f32[1,128], index: 4, kind: input, shape index: {}]   ;;  %s543_s5 = inlined_call_operand.hbm [shape: f32[128,128], index: 5, kind: input, shape index: {}]   ;;  %s544_s6 = inlined_call_operand.vmem [shape: f32[1,128], index: 6, kind: input, shape index: {}]   ;;  %s545_s7 = inlined_call_operand.hbm [shape: f32[128,128], index: 7, kind: input, shape index: {}]   ;;  %s546_s8 = inlined_call_operand.vmem [shape: f32[1,128], index: 8, kind: input, shape index: {}]   ;;  %s547_s9 = inlined_call_operand.hbm [shape: f32[8,128], index: 9, kind: output, shape index: {}]  }
   0x1   :  { %15 = vsyncpa [#allocation6], 0 }
   0x2   :  { %16 = vsyncpa [#allocation9], 0  ;;  %s34_s11 = sshll.u32 %s539_s1, 4  ;;  %s35_s11 = int_to_ptr.hbm [resolvable:$true] %s34_s11 }
   0x3   :  { %17 = vsyncpa [#allocation4], 0  ;;  %s450_s12 = smov [#allocation5]   ;;  %s61_s16 = sshll.u32 %s543_s5, 4  ;;  %s62_s16 = int_to_ptr.hbm [resolvable:$true] %s61_s16 }
   0x4   :  { %s36_s13 = sshll.u32 %s450_s12, 4  ;;  %s451_s17 = smov [#allocation8]   ;;  %s37_s13 = int_to_ptr.vmem [resolvable:$true] %s36_s13 }
   0x5   :  { %39 = dma.hbm_to_vmem [thread:$0]  %s35_s11, 128, %s37_s13, [#allocation6]  }
   0x6   :  { %s63_s18 = sshll.u32 %s451_s17, 4  ;;  %s23_s21 = sshll.u32 %s538_s0, 4  ;;  %s64_s18 = int_to_ptr.vmem [resolvable:$true] %s63_s18  ;;  %s24_s21 = int_to_ptr.hbm [resolvable:$true] %s23_s21 }
   0x7   :  { %s452_s1 = smov 128   ;;  %s453_s22 = smov 8  }
   0x8   :  { %69 = dma.hbm_to_vmem [thread:$0]  %s62_s16, 2048, %s64_s18, [#allocation9], %s452_s1, %s452_s1, %s453_s22  }
   0x9   :  { %s46_s25 = sshll.u32 %s541_s3, 4  ;;  %s454_s26 = smov [#allocation2]   ;;  %s47_s25 = int_to_ptr.hbm [resolvable:$true] %s46_s25 }
   0xa   :  { %s25_s27 = sshll.u32 %s454_s26, 4  ;;  %s455_s5 = smov [#allocation7]   ;;  %s26_s27 = int_to_ptr.vmem [resolvable:$true] %s25_s27 }
   0xb   :  { %28 = dma.hbm_to_vmem [thread:$0]  %s24_s21, 128, %s26_s27, [#allocation3]  }
   0xc   :  { %s48_s28 = sshll.u32 %s455_s5, 4  ;;  %s76_s0 = sshll.u32 %s545_s7, 4  ;;  %s49_s28 = int_to_ptr.vmem [resolvable:$true] %s48_s28  ;;  %s77_s0 = int_to_ptr.hbm [resolvable:$true] %s76_s0 }
   0xd   :  { %54 = dma.hbm_to_vmem [thread:$0]  %s47_s25, 2048, %s49_s28, [#allocation6], %s452_s1, %s452_s1, %s453_s22  }
   0xe   :  { %s456_s10 = smov [#allocation10]  }
   0xf   :  { %s78_s11 = sshll.u32 %s456_s10, 4  ;;  %s79_s11 = int_to_ptr.vmem [resolvable:$true] %s78_s11 }
  0x10   :  { %84 = dma.hbm_to_vmem [thread:$0]  %s77_s0, 2048, %s79_s11, [#allocation9], %s452_s1, %s452_s1, %s453_s22  }
  0x11   :  { %442 = dma.done.wait [#allocation3], 128  }
  0x12   :  { %443 = vsyncadd [#allocation3], 4294967168 }
  0x13   :  { %444 = dma.done.wait [#allocation6], 2176  }
  0x14   :  { %445 = vsyncadd [#allocation6], 4294965120 }
  0x15   :  { %446 = dma.done.wait [#allocation9], 4096  }
  0x16   :  { %447 = vsyncadd [#allocation9], 4294963200  ;;  %vm117_vm0 = vcmask 1045504   ;;  %vm113_vm1 = vcmask 48128   ;;  %v108_v0 = vld [vmem:[#allocation5] sm:$0x3f] }
  0x17   :  { %v107_v1 = vld [vmem:[#allocation2] sm:$0xff]  ;;  %v157_v2 = vld [vmem:[#allocation7 + $0x78] sm:$0xff]  ;;  %284 = vmatpush.msk.msra.mxu0 %vm117_vm0, %v108_v0  ;;  %v155_v4 = vld [vmem:[#allocation7 + $0x68] sm:$0xff]  ;;  %s457_s16 = smov [#allocation11]   ;;  %s272_s20 = sshll.u32 %s547_s9, 4  ;;  %s273_s20 = int_to_ptr.hbm [resolvable:$true] %s272_s20 }
  0x18   :  { %162 = vmatpush.msra.mxu1 %v157_v2  ;;  %v156_v3 = vld [vmem:[#allocation7 + $0x70] sm:$0xff]  ;;  %285 = vmatmul.msk.f32.vlgmr.msra.gmra.mxu0 %vm113_vm1, %v107_v1  ;;  %v154_v5 = vld [vmem:[#allocation7 + $0x60] sm:$0xff]  ;;  %v153_v6 = vld [vmem:[#allocation7 + $0x58] sm:$0xff]  ;;  %s270_s17 = sshll.u32 %s457_s16, 4  ;;  %s271_s17 = int_to_ptr.vmem [resolvable:$true] %s270_s17 }
  0x19   :  { %v152_v7 = vld [vmem:[#allocation7 + $0x50] sm:$0xff]  ;;  %v151_v8 = vld [vmem:[#allocation7 + $0x48] sm:$0xff]  ;;  %v150_v9 = vld [vmem:[#allocation7 + $0x40] sm:$0xff] }
  0x1a   :  { %163 = vmatpush.msra.mxu1 %v156_v3  ;;  %v149_v10 = vld [vmem:[#allocation7 + $0x38] sm:$0xff]  ;;  %v148_v11 = vld [vmem:[#allocation7 + $0x30] sm:$0xff]  ;;  %v147_v12 = vld [vmem:[#allocation7 + $0x28] sm:$0xff] }
  0x1b   :  { %v146_v13 = vld [vmem:[#allocation7 + $0x20] sm:$0xff]  ;;  %v145_v14 = vld [vmem:[#allocation7 + $0x18] sm:$0xff]  ;;  %v144_v15 = vld [vmem:[#allocation7 + $0x10] sm:$0xff] }
  0x1c   :  { %164 = vmatpush.msra.mxu1 %v155_v4  ;;  %v143_v16 = vld [vmem:[#allocation7 + $0x8] sm:$0xff]  ;;  %v142_v17 = vld [vmem:[#allocation7] sm:$0xff]  ;;  %v198_v18 = vld [vmem:[#allocation8 + $0x78] sm:$0xff] }
  0x1d   :  { %v197_v19 = vld [vmem:[#allocation8 + $0x70] sm:$0xff]  ;;  %203 = vmatpush.msra.mxu2 %v198_v18  ;;  %v196_v20 = vld [vmem:[#allocation8 + $0x68] sm:$0xff]  ;;  %v195_v21 = vld [vmem:[#allocation8 + $0x60] sm:$0xff] }
  0x1e   :  { %165 = vmatpush.msra.mxu1 %v154_v5  ;;  %v194_v22 = vld [vmem:[#allocation8 + $0x58] sm:$0xff]  ;;  %v193_v23 = vld [vmem:[#allocation8 + $0x50] sm:$0xff]  ;;  %v192_v24 = vld [vmem:[#allocation8 + $0x48] sm:$0xff] }
  0x1f   :  { %204 = vmatpush.msra.mxu2 %v197_v19  ;;  %v191_v25 = vld [vmem:[#allocation8 + $0x40] sm:$0xff]  ;;  %v190_v26 = vld [vmem:[#allocation8 + $0x38] sm:$0xff]  ;;  %v189_v27 = vld [vmem:[#allocation8 + $0x30] sm:$0xff] }
  0x20   :  { %166 = vmatpush.msra.mxu1 %v153_v6  ;;  %v188_v28 = vld [vmem:[#allocation8 + $0x28] sm:$0xff]  ;;  %v187_v29 = vld [vmem:[#allocation8 + $0x20] sm:$0xff]  ;;  %v186_v30 = vld [vmem:[#allocation8 + $0x18] sm:$0xff] }
  0x21   :  { %205 = vmatpush.msra.mxu2 %v196_v20  ;;  %v294_v31 = vld [vmem:[%s540_s2] ss:$0 sm:$0xff]  ;;  %v184_v36 = vld [vmem:[#allocation8 + $0x8] sm:$0xff]  ;;  %v183_v37 = vld [vmem:[#allocation8] sm:$0xff] }
  0x22   :  { %167 = vmatpush.msra.mxu1 %v152_v7  ;;  %v185_v35 = vld [vmem:[#allocation8 + $0x10] sm:$0xff]  ;;  %v239_v38 = vld [vmem:[#allocation10 + $0x78] sm:$0xff]  ;;  %v237_v40 = vld [vmem:[#allocation10 + $0x68] sm:$0xff] }
  0x23   :  { %206 = vmatpush.msra.mxu2 %v195_v21  ;;  %v238_v39 = vld [vmem:[#allocation10 + $0x70] sm:$0xff]  ;;  %244 = vmatpush.msra.mxu3 %v239_v38  ;;  %v236_v41 = vld [vmem:[#allocation10 + $0x60] sm:$0xff]  ;;  %v235_v42 = vld [vmem:[#allocation10 + $0x58] sm:$0xff] }
  0x24   :  { %168 = vmatpush.msra.mxu1 %v151_v8  ;;  %v234_v43 = vld [vmem:[#allocation10 + $0x50] sm:$0xff]  ;;  %v233_v44 = vld [vmem:[#allocation10 + $0x48] sm:$0xff]  ;;  %v232_v45 = vld [vmem:[#allocation10 + $0x40] sm:$0xff] }
  0x25   :  { %207 = vmatpush.msra.mxu2 %v194_v22  ;;  %245 = vmatpush.msra.mxu3 %v238_v39  ;;  %v231_v46 = vld [vmem:[#allocation10 + $0x38] sm:$0xff]  ;;  %v230_v47 = vld [vmem:[#allocation10 + $0x30] sm:$0xff]  ;;  %v229_v48 = vld [vmem:[#allocation10 + $0x28] sm:$0xff] }
  0x26   :  { %169 = vmatpush.msra.mxu1 %v150_v9  ;;  %v228_v49 = vld [vmem:[#allocation10 + $0x20] sm:$0xff]  ;;  %v227_v50 = vld [vmem:[#allocation10 + $0x18] sm:$0xff]  ;;  %v295_v51 = vld [vmem:[%s542_s4] ss:$0 sm:$0xff] }
  0x27   :  { %208 = vmatpush.msra.mxu2 %v193_v23  ;;  %246 = vmatpush.msra.mxu3 %v237_v40  ;;  %v226_v55 = vld [vmem:[#allocation10 + $0x10] sm:$0xff]  ;;  %v225_v56 = vld [vmem:[#allocation10 + $0x8] sm:$0xff]  ;;  %v224_v57 = vld [vmem:[#allocation10] sm:$0xff] }
  0x28   :  { %170 = vmatpush.msra.mxu1 %v149_v10  ;;  %v296_v58 = vld [vmem:[%s544_s6] ss:$0 sm:$0xff] }
  0x29   :  { %209 = vmatpush.msra.mxu2 %v192_v24  ;;  %247 = vmatpush.msra.mxu3 %v236_v41  ;;  %v297_v62 = vld [vmem:[%s546_s8] ss:$0 sm:$0xff] }
  0x2a   :  { %171 = vmatpush.msra.mxu1 %v148_v11 }
  0x2b   :  { %210 = vmatpush.msra.mxu2 %v191_v25  ;;  %248 = vmatpush.msra.mxu3 %v235_v42 }
  0x2c   :  { %172 = vmatpush.msra.mxu1 %v147_v12 }
  0x2d   :  { %211 = vmatpush.msra.mxu2 %v190_v26  ;;  %249 = vmatpush.msra.mxu3 %v234_v43 }
  0x2e   :  { %173 = vmatpush.msra.mxu1 %v146_v13 }
  0x2f   :  { %212 = vmatpush.msra.mxu2 %v189_v27  ;;  %250 = vmatpush.msra.mxu3 %v233_v44 }
  0x30   :  { %174 = vmatpush.msra.mxu1 %v145_v14 }
  0x31   :  { %213 = vmatpush.msra.mxu2 %v188_v28  ;;  %251 = vmatpush.msra.mxu3 %v232_v45 }
  0x32   :  { %175 = vmatpush.msra.mxu1 %v144_v15 }
  0x33   :  { %214 = vmatpush.msra.mxu2 %v187_v29  ;;  %252 = vmatpush.msra.mxu3 %v231_v46 }
  0x34   :  { %176 = vmatpush.msra.mxu1 %v143_v16 }
  0x35   :  { %215 = vmatpush.msra.mxu2 %v186_v30  ;;  %253 = vmatpush.msra.mxu3 %v230_v47 }
  0x36   :  { %177 = vmatpush.msra.mxu1 %v142_v17 }
  0x37   :  { %216 = vmatpush.msra.mxu2 %v185_v35  ;;  %254 = vmatpush.msra.mxu3 %v229_v48 }
  0x39   :  { %217 = vmatpush.msra.mxu2 %v184_v36  ;;  %255 = vmatpush.msra.mxu3 %v228_v49 }
  0x3b   :  { %218 = vmatpush.msra.mxu2 %v183_v37  ;;  %256 = vmatpush.msra.mxu3 %v227_v50 }
  0x3d   :  { %257 = vmatpush.msra.mxu3 %v226_v55 }
  0x3f   :  { %258 = vmatpush.msra.mxu3 %v225_v56 }
  0x41   :  { %259 = vmatpush.msra.mxu3 %v224_v57 }
  0x95   :  { %v138_v32 = vpop.f32.mrf.mxu0 }
  0x96   :  { %v139_v33 = vadd.f32 %v294_v31, %v138_v32 }
  0x98   :  { %v141_v34 = vmax.f32 %v139_v33, 0.0 }
  0x9a   :  { %178 = vmatmul.f32.vlgmr.msra.gmra.mxu1 %v141_v34 }
 0x117   :  { %v179_v52 = vpop.f32.mrf.mxu1 }
 0x118   :  { %v180_v53 = vadd.f32 %v295_v51, %v179_v52 }
 0x11a   :  { %v182_v54 = vmax.f32 %v180_v53, 0.0 }
 0x11c   :  { %219 = vmatmul.f32.vlgmr.msra.gmra.mxu2 %v182_v54 }
 0x19f   :  { %v220_v59 = vpop.f32.mrf.mxu2 }
 0x1a0   :  { %v221_v60 = vadd.f32 %v296_v58, %v220_v59 }
 0x1a2   :  { %v223_v61 = vmax.f32 %v221_v60, 0.0 }
 0x1a4   :  { %260 = vmatmul.f32.vlgmr.msra.gmra.mxu3 %v223_v61 }
 0x227   :  { %v261_v63 = vpop.f32.mrf.mxu3 }
 0x228   :  { %v262_v0 = vadd.f32 %v297_v62, %v261_v63 }
 0x22a   :  { %264 = vst [vmem:[#allocation11] sm:$0xff] %v262_v0 }
 0x22b   :  { %275 = dma.vmem_to_hbm [thread:$0]  %s271_s17, 128, %s273_s20, [#allocation4]  }
 0x22c   :  { %448 = dma.done.wait [#allocation4], 128  }
 0x22d   :  { %449 = vsyncadd [#allocation4], 4294967168 }
 0x22e   :  { %280 = vsyncpa [#allocation3], 1 }
 0x22f   :  { %281 = vsyncpa [#allocation6], 1 }
 0x230   :  { %282 = vsyncpa [#allocation9], 1 }
 0x231   :  { %283 = vsyncpa [#allocation4], 1 }

</bundles_post_ra>
